<compile_context>
chip_gen: v6e
topology: v6e:2x2x1
jax: 0.10.0
libtpu: 0.0.40
codegen_flags: <defaults>
</compile_context>

<pallas_src>
import jax
import jax.numpy as jnp
from jax.experimental import pallas as pl
from jax.experimental.pallas import tpu as pltpu


def _round_up(x, m):
    return (x + m - 1) // m * m


def _log_sigmoid(x):
    # Stable log(sigmoid(x)) = min(x, 0) - log(1 + exp(-|x|)); uses only
    # exp/log so it lowers on v5e/v6e/v7x alike.
    return jnp.minimum(x, 0.0) - jnp.log(1.0 + jnp.exp(-jnp.abs(x)))


def _skipgram_tile_kernel(in_lab_ref, out_lab_ref, noi_lab_ref,
                          in_w_ref, out_w_ref, row_loss_ref):
    tb = in_lab_ref.shape[0]
    vocab = in_w_ref.shape[0]
    n_ctx = out_lab_ref.shape[1]
    n_neg = noi_lab_ref.shape[1]

    in_lab = in_lab_ref[...]                       # (tb, 1)  int32
    out_lab = out_lab_ref[...]                     # (tb, C)  int32
    noi_lab = noi_lab_ref[...]                     # (tb, N)  int32
    in_w = in_w_ref[...].astype(jnp.float32)       # (V, E)
    out_w = out_w_ref[...].astype(jnp.float32)     # (V, E)

    vocab_iota = jax.lax.broadcasted_iota(jnp.int32, (tb, vocab), 1)

    # --- input embedding gather: one-hot(label) @ in_w -----------------------
    onehot_in = (vocab_iota == in_lab).astype(jnp.float32)             # (tb, V)
    inp = jnp.dot(onehot_in, in_w, preferred_element_type=jnp.float32)  # (tb, E)

    # --- log_target: sum_e log_sigmoid( inp[b,e] * sum_c out_emb[b,c,e] ) ----
    # sum_c out_embed[out_lab[b,c]] == (per-row class counts) @ out_w, i.e. a
    # single matmul instead of C gathers.
    count = jnp.zeros((tb, vocab), jnp.float32)
    for c in range(n_ctx):                                   # static unroll
        count = count + (vocab_iota == out_lab[:, c:c + 1]).astype(jnp.float32)
    ctx_sum = jnp.dot(count, out_w, preferred_element_type=jnp.float32)  # (tb, E)

    log_target = jnp.sum(_log_sigmoid(inp * ctx_sum),
                         axis=1, keepdims=True)                          # (tb, 1)

    # --- sum_log_sampled: sum_n log_sigmoid( inp[b,:] . out_w[noise[b,n],:] ) -
    # scores[b, v] = inp[b,:] . out_w[v,:]   (contract on E, no transpose)
    scores = jax.lax.dot_general(
        inp, out_w, (((1,), (1,)), ((), ())),
        preferred_element_type=jnp.float32)                              # (tb, V)
    sum_log_sampled = jnp.zeros((tb, 1), jnp.float32)
    for n in range(n_neg):                                   # static unroll
        sel = (vocab_iota == noi_lab[:, n:n + 1]).astype(jnp.float32)    # (tb, V)
        dot_n = jnp.sum(sel * scores, axis=1, keepdims=True)             # (tb, 1)
        sum_log_sampled = sum_log_sampled + _log_sigmoid(dot_n)

    # Per-row contribution; sign and 1/B fold happen outside the kernel.
    row_loss_ref[...] = log_target + sum_log_sampled


def skipgram_loss(in_weight, out_weight, input_labels, out_labels, noise_labels,
                  *, tile_b=None):
    vocab, embed = in_weight.shape
    batch = input_labels.shape[0]
    n_ctx = out_labels.shape[1]
    n_neg = noise_labels.shape[1]

    if tile_b is None:
        tile_b = 256 if batch >= 256 else _round_up(batch, 8)
    tile_b = max(8, _round_up(tile_b, 8))
    b_pad = _round_up(batch, tile_b)
    num_tiles = b_pad // tile_b
    pad = b_pad - batch

    in_lab = jnp.pad(input_labels.astype(jnp.int32), (0, pad)).reshape(b_pad, 1)
    out_lab = jnp.pad(out_labels.astype(jnp.int32), ((0, pad), (0, 0)))
    noi_lab = jnp.pad(noise_labels.astype(jnp.int32), ((0, pad), (0, 0)))

    per_row = pl.pallas_call(
        _skipgram_tile_kernel,
        out_shape=jax.ShapeDtypeStruct((b_pad, 1), jnp.float32),
        grid=(num_tiles,),
        in_specs=[
            pl.BlockSpec((tile_b, 1), lambda i: (i, 0)),        # input labels
            pl.BlockSpec((tile_b, n_ctx), lambda i: (i, 0)),    # context labels
            pl.BlockSpec((tile_b, n_neg), lambda i: (i, 0)),    # noise labels
            pl.BlockSpec((vocab, embed), lambda i: (0, 0)),     # in_embed table (VMEM-resident)
            pl.BlockSpec((vocab, embed), lambda i: (0, 0)),     # out_embed table (VMEM-resident)
        ],
        out_specs=pl.BlockSpec((tile_b, 1), lambda i: (i, 0)),
        compiler_params=pltpu.CompilerParams(
            dimension_semantics=("parallel",)),                 # megacore-friendly on v7x
    )(in_lab, out_lab, noi_lab,
      in_weight.astype(jnp.float32), out_weight.astype(jnp.float32))

    # Drop padded rows, fold -1/B in a single scalar op.
    return -jnp.sum(per_row[:batch, 0]) / batch


if __name__ == "__main__":
    key = jax.random.PRNGKey(0)
    num_classes, embed_size = 64, 128
    B, C, num_sampled = 16, 8, 8

    k1, k2, k3, k4, k5 = jax.random.split(key, 5)

    # nn.Embedding(num_classes, embed_size) weights.
    # PyTorch init: out_embed ~ U(-0.1, 0.1); in_embed ~ U(-0.0, 0.0) (zeros).
    # Use U(-0.1, 0.1) for in_embed too so the kernel math is non-degenerate.
    out_weight = jax.random.uniform(k1, (num_classes, embed_size), jnp.float32, -0.1, 0.1)
    in_weight = jax.random.uniform(k2, (num_classes, embed_size), jnp.float32, -0.1, 0.1)

    input_labels = jax.random.randint(k3, (B,), 0, num_classes)
    out_labels = jax.random.randint(k4, (B, C), 0, num_classes)
    # TODO(synk): sampler.get_sample substituted with deterministic uniform draws.
    noise_labels = jax.random.randint(k5, (B, num_sampled), 0, num_classes)

    loss = skipgram_loss(in_weight, out_weight, input_labels, out_labels,
                         noise_labels, tile_b=8)
    loss = jax.block_until_ready(loss)

    # Pure-JAX reference (mirrors the PyTorch forward exactly).
    inp = jnp.take(in_weight, input_labels, axis=0)
    outp = jnp.take(out_weight, out_labels, axis=0)
    noi = jnp.take(out_weight, noise_labels, axis=0)
    lt = jnp.sum(jnp.log(jax.nn.sigmoid(jnp.sum(inp[:, None, :] * outp, axis=1))), axis=1)
    sls = jnp.sum(jnp.log(jax.nn.sigmoid(jnp.einsum('bne,be->bn', noi, inp))), axis=1)
    ref = -jnp.sum(lt + sls) / B

    assert abs(float(loss) - float(ref)) < 1e-3 + 1e-4 * abs(float(ref)), \
        (float(loss), float(ref))
    print("KERNEL_OK")
</pallas_src>

<mosaic_0001>
module attributes {stable_mosaic.version = 11 : i64} {
  func.func @_skipgram_tile_kernel(%arg0: i32, %arg1: memref<8x1xi32, #tpu.memory_space<vmem>>, %arg2: memref<8x8xi32, #tpu.memory_space<vmem>>, %arg3: memref<8x8xi32, #tpu.memory_space<vmem>>, %arg4: memref<64x128xf32, #tpu.memory_space<vmem>>, %arg5: memref<64x128xf32, #tpu.memory_space<vmem>>, %arg6: memref<8x1xf32, #tpu.memory_space<vmem>>) attributes {dimension_semantics = [#tpu.dimension_semantics<parallel>], iteration_bounds = array<i64: 2>, scalar_prefetch = 0 : i64, scratch_operands = 0 : i64, tpu.core_type = #tpu.core_type<tc>, window_params = [{transform_indices = @transform_0, window_bounds = array<i64: 8, 1>}, {transform_indices = @transform_1, window_bounds = array<i64: 8, 8>}, {transform_indices = @transform_2, window_bounds = array<i64: 8, 8>}, {pipeline_mode = #tpu.pipeline_mode<synchronous>, transform_indices = @transform_3, window_bounds = array<i64: 64, 128>}, {pipeline_mode = #tpu.pipeline_mode<synchronous>, transform_indices = @transform_4, window_bounds = array<i64: 64, 128>}, {transform_indices = @transform_5, window_bounds = array<i64: 8, 1>}]} {
    %c0 = arith.constant 0 : index
    %c0_0 = arith.constant 0 : index
    %0 = vector.load %arg1[%c0, %c0_0] : memref<8x1xi32, #tpu.memory_space<vmem>>, vector<8x1xi32>
    %c0_1 = arith.constant 0 : index
    %c0_2 = arith.constant 0 : index
    %1 = vector.load %arg2[%c0_1, %c0_2] : memref<8x8xi32, #tpu.memory_space<vmem>>, vector<8x8xi32>
    %c0_3 = arith.constant 0 : index
    %c0_4 = arith.constant 0 : index
    %2 = vector.load %arg3[%c0_3, %c0_4] : memref<8x8xi32, #tpu.memory_space<vmem>>, vector<8x8xi32>
    %c0_5 = arith.constant 0 : index
    %c0_6 = arith.constant 0 : index
    %3 = vector.load %arg4[%c0_5, %c0_6] : memref<64x128xf32, #tpu.memory_space<vmem>>, vector<64x128xf32>
    %c0_7 = arith.constant 0 : index
    %c0_8 = arith.constant 0 : index
    %4 = vector.load %arg5[%c0_7, %c0_8] : memref<64x128xf32, #tpu.memory_space<vmem>>, vector<64x128xf32>
    %5 = tpu.iota {dimensions = array<i32: 1>} : vector<8x64xi32>
    %6 = vector.broadcast %0 : vector<8x1xi32> to vector<8x64xi32>
    %7 = arith.cmpi eq, %5, %6 : vector<8x64xi32>
    %8 = arith.extui %7 : vector<8x64xi1> to vector<8x64xi32>
    %9 = arith.sitofp %8 : vector<8x64xi32> to vector<8x64xf32>
    %cst = arith.constant dense<0.000000e+00> : vector<8x128xf32>
    %10 = tpu.matmul %9, %3, %cst {dimension_numbers = #tpu.dot_dimension_numbers<[1], [0], [0], [1], [0, 0, 1, 1], [], []>} : vector<8x64xf32>, vector<64x128xf32>, vector<8x128xf32> -> vector<8x128xf32>
    %cst_9 = arith.constant 0.000000e+00 : f32
    %11 = vector.broadcast %cst_9 : f32 to vector<8x64xf32>
    %12 = vector.extract_strided_slice %1 {offsets = [0, 0], sizes = [8, 1], strides = [1, 1]} : vector<8x8xi32> to vector<8x1xi32>
    %13 = vector.broadcast %12 : vector<8x1xi32> to vector<8x64xi32>
    %14 = arith.cmpi eq, %5, %13 : vector<8x64xi32>
    %15 = arith.extui %14 : vector<8x64xi1> to vector<8x64xi32>
    %16 = arith.sitofp %15 : vector<8x64xi32> to vector<8x64xf32>
    %17 = arith.addf %11, %16 : vector<8x64xf32>
    %18 = vector.extract_strided_slice %1 {offsets = [0, 1], sizes = [8, 1], strides = [1, 1]} : vector<8x8xi32> to vector<8x1xi32>
    %19 = vector.broadcast %18 : vector<8x1xi32> to vector<8x64xi32>
    %20 = arith.cmpi eq, %5, %19 : vector<8x64xi32>
    %21 = arith.extui %20 : vector<8x64xi1> to vector<8x64xi32>
    %22 = arith.sitofp %21 : vector<8x64xi32> to vector<8x64xf32>
    %23 = arith.addf %17, %22 : vector<8x64xf32>
    %24 = vector.extract_strided_slice %1 {offsets = [0, 2], sizes = [8, 1], strides = [1, 1]} : vector<8x8xi32> to vector<8x1xi32>
    %25 = vector.broadcast %24 : vector<8x1xi32> to vector<8x64xi32>
    %26 = arith.cmpi eq, %5, %25 : vector<8x64xi32>
    %27 = arith.extui %26 : vector<8x64xi1> to vector<8x64xi32>
    %28 = arith.sitofp %27 : vector<8x64xi32> to vector<8x64xf32>
    %29 = arith.addf %23, %28 : vector<8x64xf32>
    %30 = vector.extract_strided_slice %1 {offsets = [0, 3], sizes = [8, 1], strides = [1, 1]} : vector<8x8xi32> to vector<8x1xi32>
    %31 = vector.broadcast %30 : vector<8x1xi32> to vector<8x64xi32>
    %32 = arith.cmpi eq, %5, %31 : vector<8x64xi32>
    %33 = arith.extui %32 : vector<8x64xi1> to vector<8x64xi32>
    %34 = arith.sitofp %33 : vector<8x64xi32> to vector<8x64xf32>
    %35 = arith.addf %29, %34 : vector<8x64xf32>
    %36 = vector.extract_strided_slice %1 {offsets = [0, 4], sizes = [8, 1], strides = [1, 1]} : vector<8x8xi32> to vector<8x1xi32>
    %37 = vector.broadcast %36 : vector<8x1xi32> to vector<8x64xi32>
    %38 = arith.cmpi eq, %5, %37 : vector<8x64xi32>
    %39 = arith.extui %38 : vector<8x64xi1> to vector<8x64xi32>
    %40 = arith.sitofp %39 : vector<8x64xi32> to vector<8x64xf32>
    %41 = arith.addf %35, %40 : vector<8x64xf32>
    %42 = vector.extract_strided_slice %1 {offsets = [0, 5], sizes = [8, 1], strides = [1, 1]} : vector<8x8xi32> to vector<8x1xi32>
    %43 = vector.broadcast %42 : vector<8x1xi32> to vector<8x64xi32>
    %44 = arith.cmpi eq, %5, %43 : vector<8x64xi32>
    %45 = arith.extui %44 : vector<8x64xi1> to vector<8x64xi32>
    %46 = arith.sitofp %45 : vector<8x64xi32> to vector<8x64xf32>
    %47 = arith.addf %41, %46 : vector<8x64xf32>
    %48 = vector.extract_strided_slice %1 {offsets = [0, 6], sizes = [8, 1], strides = [1, 1]} : vector<8x8xi32> to vector<8x1xi32>
    %49 = vector.broadcast %48 : vector<8x1xi32> to vector<8x64xi32>
    %50 = arith.cmpi eq, %5, %49 : vector<8x64xi32>
    %51 = arith.extui %50 : vector<8x64xi1> to vector<8x64xi32>
    %52 = arith.sitofp %51 : vector<8x64xi32> to vector<8x64xf32>
    %53 = arith.addf %47, %52 : vector<8x64xf32>
    %54 = vector.extract_strided_slice %1 {offsets = [0, 7], sizes = [8, 1], strides = [1, 1]} : vector<8x8xi32> to vector<8x1xi32>
    %55 = vector.broadcast %54 : vector<8x1xi32> to vector<8x64xi32>
    %56 = arith.cmpi eq, %5, %55 : vector<8x64xi32>
    %57 = arith.extui %56 : vector<8x64xi1> to vector<8x64xi32>
    %58 = arith.sitofp %57 : vector<8x64xi32> to vector<8x64xf32>
    %59 = arith.addf %53, %58 : vector<8x64xf32>
    %cst_10 = arith.constant dense<0.000000e+00> : vector<8x128xf32>
    %60 = tpu.matmul %59, %4, %cst_10 {dimension_numbers = #tpu.dot_dimension_numbers<[1], [0], [0], [1], [0, 0, 1, 1], [], []>} : vector<8x64xf32>, vector<64x128xf32>, vector<8x128xf32> -> vector<8x128xf32>
    %61 = arith.mulf %10, %60 : vector<8x128xf32>
    %cst_11 = arith.constant 0.000000e+00 : f32
    %62 = vector.broadcast %cst_11 : f32 to vector<8x128xf32>
    %63 = arith.minimumf %61, %62 : vector<8x128xf32>
    %64 = math.absf %61 : vector<8x128xf32>
    %cst_12 = arith.constant 0.000000e+00 : f32
    %65 = vector.broadcast %cst_12 : f32 to vector<8x128xf32>
    %66 = arith.subf %65, %64 : vector<8x128xf32>
    %67 = math.exp %66 : vector<8x128xf32>
    %cst_13 = arith.constant 1.000000e+00 : f32
    %68 = vector.broadcast %cst_13 : f32 to vector<8x128xf32>
    %69 = arith.addf %68, %67 : vector<8x128xf32>
    %70 = math.log %69 : vector<8x128xf32>
    %71 = arith.subf %63, %70 : vector<8x128xf32>
    %cst_14 = arith.constant dense<0.000000e+00> : vector<8xf32>
    %72 = vector.multi_reduction <add>, %71, %cst_14 [1] : vector<8x128xf32> to vector<8xf32>
    %73 = vector.shape_cast %72 : vector<8xf32> to vector<8x1xf32>
    %cst_15 = arith.constant dense<0.000000e+00> : vector<8x64xf32>
    %74 = tpu.matmul %10, %4, %cst_15 {dimension_numbers = #tpu.dot_dimension_numbers<[1], [1], [0], [0], [0, 0, 1, 0], [], []>} : vector<8x128xf32>, vector<64x128xf32>, vector<8x64xf32> -> vector<8x64xf32>
    %cst_16 = arith.constant 0.000000e+00 : f32
    %75 = vector.broadcast %cst_16 : f32 to vector<8x1xf32>
    %76 = vector.extract_strided_slice %2 {offsets = [0, 0], sizes = [8, 1], strides = [1, 1]} : vector<8x8xi32> to vector<8x1xi32>
    %77 = vector.broadcast %76 : vector<8x1xi32> to vector<8x64xi32>
    %78 = arith.cmpi eq, %5, %77 : vector<8x64xi32>
    %79 = arith.extui %78 : vector<8x64xi1> to vector<8x64xi32>
    %80 = arith.sitofp %79 : vector<8x64xi32> to vector<8x64xf32>
    %81 = arith.mulf %80, %74 : vector<8x64xf32>
    %cst_17 = arith.constant dense<0.000000e+00> : vector<8xf32>
    %82 = vector.multi_reduction <add>, %81, %cst_17 [1] : vector<8x64xf32> to vector<8xf32>
    %83 = vector.shape_cast %82 : vector<8xf32> to vector<8x1xf32>
    %cst_18 = arith.constant 0.000000e+00 : f32
    %84 = vector.broadcast %cst_18 : f32 to vector<8x1xf32>
    %85 = arith.minimumf %83, %84 : vector<8x1xf32>
    %86 = math.absf %83 : vector<8x1xf32>
    %cst_19 = arith.constant 0.000000e+00 : f32
    %87 = vector.broadcast %cst_19 : f32 to vector<8x1xf32>
    %88 = arith.subf %87, %86 : vector<8x1xf32>
    %89 = math.exp %88 : vector<8x1xf32>
    %cst_20 = arith.constant 1.000000e+00 : f32
    %90 = vector.broadcast %cst_20 : f32 to vector<8x1xf32>
    %91 = arith.addf %90, %89 : vector<8x1xf32>
    %92 = math.log %91 : vector<8x1xf32>
    %93 = arith.subf %85, %92 : vector<8x1xf32>
    %94 = arith.addf %75, %93 : vector<8x1xf32>
    %95 = vector.extract_strided_slice %2 {offsets = [0, 1], sizes = [8, 1], strides = [1, 1]} : vector<8x8xi32> to vector<8x1xi32>
    %96 = vector.broadcast %95 : vector<8x1xi32> to vector<8x64xi32>
    %97 = arith.cmpi eq, %5, %96 : vector<8x64xi32>
    %98 = arith.extui %97 : vector<8x64xi1> to vector<8x64xi32>
    %99 = arith.sitofp %98 : vector<8x64xi32> to vector<8x64xf32>
    %100 = arith.mulf %99, %74 : vector<8x64xf32>
    %cst_21 = arith.constant dense<0.000000e+00> : vector<8xf32>
    %101 = vector.multi_reduction <add>, %100, %cst_21 [1] : vector<8x64xf32> to vector<8xf32>
    %102 = vector.shape_cast %101 : vector<8xf32> to vector<8x1xf32>
    %cst_22 = arith.constant 0.000000e+00 : f32
    %103 = vector.broadcast %cst_22 : f32 to vector<8x1xf32>
    %104 = arith.minimumf %102, %103 : vector<8x1xf32>
    %105 = math.absf %102 : vector<8x1xf32>
    %cst_23 = arith.constant 0.000000e+00 : f32
    %106 = vector.broadcast %cst_23 : f32 to vector<8x1xf32>
    %107 = arith.subf %106, %105 : vector<8x1xf32>
    %108 = math.exp %107 : vector<8x1xf32>
    %cst_24 = arith.constant 1.000000e+00 : f32
    %109 = vector.broadcast %cst_24 : f32 to vector<8x1xf32>
    %110 = arith.addf %109, %108 : vector<8x1xf32>
    %111 = math.log %110 : vector<8x1xf32>
    %112 = arith.subf %104, %111 : vector<8x1xf32>
    %113 = arith.addf %94, %112 : vector<8x1xf32>
    %114 = vector.extract_strided_slice %2 {offsets = [0, 2], sizes = [8, 1], strides = [1, 1]} : vector<8x8xi32> to vector<8x1xi32>
    %115 = vector.broadcast %114 : vector<8x1xi32> to vector<8x64xi32>
    %116 = arith.cmpi eq, %5, %115 : vector<8x64xi32>
    %117 = arith.extui %116 : vector<8x64xi1> to vector<8x64xi32>
    %118 = arith.sitofp %117 : vector<8x64xi32> to vector<8x64xf32>
    %119 = arith.mulf %118, %74 : vector<8x64xf32>
    %cst_25 = arith.constant dense<0.000000e+00> : vector<8xf32>
    %120 = vector.multi_reduction <add>, %119, %cst_25 [1] : vector<8x64xf32> to vector<8xf32>
    %121 = vector.shape_cast %120 : vector<8xf32> to vector<8x1xf32>
    %cst_26 = arith.constant 0.000000e+00 : f32
    %122 = vector.broadcast %cst_26 : f32 to vector<8x1xf32>
    %123 = arith.minimumf %121, %122 : vector<8x1xf32>
    %124 = math.absf %121 : vector<8x1xf32>
    %cst_27 = arith.constant 0.000000e+00 : f32
    %125 = vector.broadcast %cst_27 : f32 to vector<8x1xf32>
    %126 = arith.subf %125, %124 : vector<8x1xf32>
    %127 = math.exp %126 : vector<8x1xf32>
    %cst_28 = arith.constant 1.000000e+00 : f32
    %128 = vector.broadcast %cst_28 : f32 to vector<8x1xf32>
    %129 = arith.addf %128, %127 : vector<8x1xf32>
    %130 = math.log %129 : vector<8x1xf32>
    %131 = arith.subf %123, %130 : vector<8x1xf32>
    %132 = arith.addf %113, %131 : vector<8x1xf32>
    %133 = vector.extract_strided_slice %2 {offsets = [0, 3], sizes = [8, 1], strides = [1, 1]} : vector<8x8xi32> to vector<8x1xi32>
    %134 = vector.broadcast %133 : vector<8x1xi32> to vector<8x64xi32>
    %135 = arith.cmpi eq, %5, %134 : vector<8x64xi32>
    %136 = arith.extui %135 : vector<8x64xi1> to vector<8x64xi32>
    %137 = arith.sitofp %136 : vector<8x64xi32> to vector<8x64xf32>
    %138 = arith.mulf %137, %74 : vector<8x64xf32>
    %cst_29 = arith.constant dense<0.000000e+00> : vector<8xf32>
    %139 = vector.multi_reduction <add>, %138, %cst_29 [1] : vector<8x64xf32> to vector<8xf32>
    %140 = vector.shape_cast %139 : vector<8xf32> to vector<8x1xf32>
    %cst_30 = arith.constant 0.000000e+00 : f32
    %141 = vector.broadcast %cst_30 : f32 to vector<8x1xf32>
    %142 = arith.minimumf %140, %141 : vector<8x1xf32>
    %143 = math.absf %140 : vector<8x1xf32>
    %cst_31 = arith.constant 0.000000e+00 : f32
    %144 = vector.broadcast %cst_31 : f32 to vector<8x1xf32>
    %145 = arith.subf %144, %143 : vector<8x1xf32>
    %146 = math.exp %145 : vector<8x1xf32>
    %cst_32 = arith.constant 1.000000e+00 : f32
    %147 = vector.broadcast %cst_32 : f32 to vector<8x1xf32>
    %148 = arith.addf %147, %146 : vector<8x1xf32>
    %149 = math.log %148 : vector<8x1xf32>
    %150 = arith.subf %142, %149 : vector<8x1xf32>
    %151 = arith.addf %132, %150 : vector<8x1xf32>
    %152 = vector.extract_strided_slice %2 {offsets = [0, 4], sizes = [8, 1], strides = [1, 1]} : vector<8x8xi32> to vector<8x1xi32>
    %153 = vector.broadcast %152 : vector<8x1xi32> to vector<8x64xi32>
    %154 = arith.cmpi eq, %5, %153 : vector<8x64xi32>
    %155 = arith.extui %154 : vector<8x64xi1> to vector<8x64xi32>
    %156 = arith.sitofp %155 : vector<8x64xi32> to vector<8x64xf32>
    %157 = arith.mulf %156, %74 : vector<8x64xf32>
    %cst_33 = arith.constant dense<0.000000e+00> : vector<8xf32>
    %158 = vector.multi_reduction <add>, %157, %cst_33 [1] : vector<8x64xf32> to vector<8xf32>
    %159 = vector.shape_cast %158 : vector<8xf32> to vector<8x1xf32>
    %cst_34 = arith.constant 0.000000e+00 : f32
    %160 = vector.broadcast %cst_34 : f32 to vector<8x1xf32>
    %161 = arith.minimumf %159, %160 : vector<8x1xf32>
    %162 = math.absf %159 : vector<8x1xf32>
    %cst_35 = arith.constant 0.000000e+00 : f32
    %163 = vector.broadcast %cst_35 : f32 to vector<8x1xf32>
    %164 = arith.subf %163, %162 : vector<8x1xf32>
    %165 = math.exp %164 : vector<8x1xf32>
    %cst_36 = arith.constant 1.000000e+00 : f32
    %166 = vector.broadcast %cst_36 : f32 to vector<8x1xf32>
    %167 = arith.addf %166, %165 : vector<8x1xf32>
    %168 = math.log %167 : vector<8x1xf32>
    %169 = arith.subf %161, %168 : vector<8x1xf32>
    %170 = arith.addf %151, %169 : vector<8x1xf32>
    %171 = vector.extract_strided_slice %2 {offsets = [0, 5], sizes = [8, 1], strides = [1, 1]} : vector<8x8xi32> to vector<8x1xi32>
    %172 = vector.broadcast %171 : vector<8x1xi32> to vector<8x64xi32>
    %173 = arith.cmpi eq, %5, %172 : vector<8x64xi32>
    %174 = arith.extui %173 : vector<8x64xi1> to vector<8x64xi32>
    %175 = arith.sitofp %174 : vector<8x64xi32> to vector<8x64xf32>
    %176 = arith.mulf %175, %74 : vector<8x64xf32>
    %cst_37 = arith.constant dense<0.000000e+00> : vector<8xf32>
    %177 = vector.multi_reduction <add>, %176, %cst_37 [1] : vector<8x64xf32> to vector<8xf32>
    %178 = vector.shape_cast %177 : vector<8xf32> to vector<8x1xf32>
    %cst_38 = arith.constant 0.000000e+00 : f32
    %179 = vector.broadcast %cst_38 : f32 to vector<8x1xf32>
    %180 = arith.minimumf %178, %179 : vector<8x1xf32>
    %181 = math.absf %178 : vector<8x1xf32>
    %cst_39 = arith.constant 0.000000e+00 : f32
    %182 = vector.broadcast %cst_39 : f32 to vector<8x1xf32>
    %183 = arith.subf %182, %181 : vector<8x1xf32>
    %184 = math.exp %183 : vector<8x1xf32>
    %cst_40 = arith.constant 1.000000e+00 : f32
    %185 = vector.broadcast %cst_40 : f32 to vector<8x1xf32>
    %186 = arith.addf %185, %184 : vector<8x1xf32>
    %187 = math.log %186 : vector<8x1xf32>
    %188 = arith.subf %180, %187 : vector<8x1xf32>
    %189 = arith.addf %170, %188 : vector<8x1xf32>
    %190 = vector.extract_strided_slice %2 {offsets = [0, 6], sizes = [8, 1], strides = [1, 1]} : vector<8x8xi32> to vector<8x1xi32>
    %191 = vector.broadcast %190 : vector<8x1xi32> to vector<8x64xi32>
    %192 = arith.cmpi eq, %5, %191 : vector<8x64xi32>
    %193 = arith.extui %192 : vector<8x64xi1> to vector<8x64xi32>
    %194 = arith.sitofp %193 : vector<8x64xi32> to vector<8x64xf32>
    %195 = arith.mulf %194, %74 : vector<8x64xf32>
    %cst_41 = arith.constant dense<0.000000e+00> : vector<8xf32>
    %196 = vector.multi_reduction <add>, %195, %cst_41 [1] : vector<8x64xf32> to vector<8xf32>
    %197 = vector.shape_cast %196 : vector<8xf32> to vector<8x1xf32>
    %cst_42 = arith.constant 0.000000e+00 : f32
    %198 = vector.broadcast %cst_42 : f32 to vector<8x1xf32>
    %199 = arith.minimumf %197, %198 : vector<8x1xf32>
    %200 = math.absf %197 : vector<8x1xf32>
    %cst_43 = arith.constant 0.000000e+00 : f32
    %201 = vector.broadcast %cst_43 : f32 to vector<8x1xf32>
    %202 = arith.subf %201, %200 : vector<8x1xf32>
    %203 = math.exp %202 : vector<8x1xf32>
    %cst_44 = arith.constant 1.000000e+00 : f32
    %204 = vector.broadcast %cst_44 : f32 to vector<8x1xf32>
    %205 = arith.addf %204, %203 : vector<8x1xf32>
    %206 = math.log %205 : vector<8x1xf32>
    %207 = arith.subf %199, %206 : vector<8x1xf32>
    %208 = arith.addf %189, %207 : vector<8x1xf32>
    %209 = vector.extract_strided_slice %2 {offsets = [0, 7], sizes = [8, 1], strides = [1, 1]} : vector<8x8xi32> to vector<8x1xi32>
    %210 = vector.broadcast %209 : vector<8x1xi32> to vector<8x64xi32>
    %211 = arith.cmpi eq, %5, %210 : vector<8x64xi32>
    %212 = arith.extui %211 : vector<8x64xi1> to vector<8x64xi32>
    %213 = arith.sitofp %212 : vector<8x64xi32> to vector<8x64xf32>
    %214 = arith.mulf %213, %74 : vector<8x64xf32>
    %cst_45 = arith.constant dense<0.000000e+00> : vector<8xf32>
    %215 = vector.multi_reduction <add>, %214, %cst_45 [1] : vector<8x64xf32> to vector<8xf32>
    %216 = vector.shape_cast %215 : vector<8xf32> to vector<8x1xf32>
    %cst_46 = arith.constant 0.000000e+00 : f32
    %217 = vector.broadcast %cst_46 : f32 to vector<8x1xf32>
    %218 = arith.minimumf %216, %217 : vector<8x1xf32>
    %219 = math.absf %216 : vector<8x1xf32>
    %cst_47 = arith.constant 0.000000e+00 : f32
    %220 = vector.broadcast %cst_47 : f32 to vector<8x1xf32>
    %221 = arith.subf %220, %219 : vector<8x1xf32>
    %222 = math.exp %221 : vector<8x1xf32>
    %cst_48 = arith.constant 1.000000e+00 : f32
    %223 = vector.broadcast %cst_48 : f32 to vector<8x1xf32>
    %224 = arith.addf %223, %222 : vector<8x1xf32>
    %225 = math.log %224 : vector<8x1xf32>
    %226 = arith.subf %218, %225 : vector<8x1xf32>
    %227 = arith.addf %208, %226 : vector<8x1xf32>
    %228 = arith.addf %73, %227 : vector<8x1xf32>
    %c0_49 = arith.constant 0 : index
    %c0_50 = arith.constant 0 : index
    %229 = vector.load %arg6[%c0_49, %c0_50] : memref<8x1xf32, #tpu.memory_space<vmem>>, vector<8x1xf32>
    tpu.vector_store %arg6[%c0_49, %c0_50], %228 {strides = array<i32>} : memref<8x1xf32, #tpu.memory_space<vmem>>, vector<8x1xf32>,
    return
  }
  func.func @transform_0(%arg0: i32) -> (i32, i32) {
    %c0_i32 = arith.constant 0 : i32
    %c0_i32_0 = arith.constant 0 : i32
    return %arg0, %c0_i32 : i32, i32
  }
  func.func @transform_1(%arg0: i32) -> (i32, i32) {
    %c0_i32 = arith.constant 0 : i32
    %c0_i32_0 = arith.constant 0 : i32
    return %arg0, %c0_i32 : i32, i32
  }
  func.func @transform_2(%arg0: i32) -> (i32, i32) {
    %c0_i32 = arith.constant 0 : i32
    %c0_i32_0 = arith.constant 0 : i32
    return %arg0, %c0_i32 : i32, i32
  }
  func.func @transform_3(%arg0: i32) -> (i32, i32) {
    %c0_i32 = arith.constant 0 : i32
    %c0_i32_0 = arith.constant 0 : i32
    %c0_i32_1 = arith.constant 0 : i32
    return %c0_i32, %c0_i32_0 : i32, i32
  }
  func.func @transform_4(%arg0: i32) -> (i32, i32) {
    %c0_i32 = arith.constant 0 : i32
    %c0_i32_0 = arith.constant 0 : i32
    %c0_i32_1 = arith.constant 0 : i32
    return %c0_i32, %c0_i32_0 : i32, i32
  }
  func.func @transform_5(%arg0: i32) -> (i32, i32) {
    %c0_i32 = arith.constant 0 : i32
    %c0_i32_0 = arith.constant 0 : i32
    return %arg0, %c0_i32 : i32, i32
  }
}

</mosaic_0001>

<bundles_post_ra>
// kernel: tpu_custom_call.1
= control target key start
LH: loop header
LB: loop body
LE: loop exit
PB: predicated region body
PF: predicated region fallthrough
CT: control target
= control target key end

     0   :  { %10 = vsyncpa [#allocation3], 0  ;;  %s1113_s18 = smov 0   ;;  %s1319_s0 = inlined_call_operand.vmem [shape: s32[16,1], index: 0, kind: input, shape index: {}]   ;;  %s1320_s1 = inlined_call_operand.vmem [shape: s32[16,8], index: 1, kind: input, shape index: {}]   ;;  %s1321_s2 = inlined_call_operand.vmem [shape: s32[16,8], index: 2, kind: input, shape index: {}]   ;;  %s1322_s3 = inlined_call_operand.vmem [shape: f32[64,128], index: 3, kind: input, shape index: {}]   ;;  %s1323_s4 = inlined_call_operand.hbm [shape: f32[64,128], index: 4, kind: input, shape index: {}]   ;;  %s1324_s5 = inlined_call_operand.vmem [shape: f32[16,1], index: 5, kind: output, shape index: {}]  }
   0x1 LB: > { %s1119_s19 = sadd.s32 4294967295, %s1068_s18   ;;  %p835_p0 = scmp.ge.s32.totalorder %s1068_s18, 1  ;;  %s1068_s18 = sphi %s1113_s18, %s16_s18  }
   0x2   : > { %p167_p1 = scmp.lt.s32.totalorder %s1068_s18, 3  ;;  %s1070_s20 = smov [#allocation2]  }
   0x3   : > { %s182_s21 = sshll.u32 %s1070_s20, 4  ;;  %p957_p3 = scmp.eq.s32.totalorder %s1119_s19, 0  ;;  %s183_s21 = int_to_ptr.vmem [resolvable:$true] %s182_s21 }
   0x4   : > { %p1123_p2 = pnand %p835_p0, %p167_p1  ;;  %s1043_s23 = scalar_lea.vmem %s183_s21, 1024 }
   0x5   : > { %p1044_p7 = scmp.ne.s32.totalorder %s183_s21, %s1043_s23  ;;  %p1051_p10 = scmp.lt.s32.totalorder %s183_s21, %s183_s21 }
   0x6   : > { %p953_p4 = pneg %p1123_p2  ;;  %p1052_p11 = scmp.lt.s32.totalorder %s1043_s23, %s1043_s23 }
   0x8   : > { %p954_p5 = pnand %p957_p3, %p953_p4  ;;  %p1053_p12 = por %p1052_p11, %p1051_p10 }
   0xa   : > { %p1034_p6 = pneg %p954_p5 }
   0xc   : > { %p1046_p8 = pnand %p1044_p7, %p1034_p6 }
   0xe   : > { %p1047_p9 = pneg %p1046_p8 }
  0x10   : > { %p1054_p13 = pnand %p1053_p12, %p1047_p9 }
  0x12   : > { %1057 = shalt.err (!%p1054_p13)
}
  0x13   : > { %s1071_s24 = smov 128   ;;  %s1072_s25 = smov 8  }
  0x14   : > { %956 = dma.hbm_to_vmem [thread:$0]  (!%p954_p5), %s1323_s4, 1024, %s183_s21, [#allocation3], %s1071_s24, %s1071_s24, %s1072_s25  }
  0x15   : > { %219 = sbr.rel (%p1123_p2) target bundleno = 750 (0x2ee), region = 40 }
  0x1a   : > { %1063 = dma.done.wait (%p957_p3), [#allocation3], 1024  }
  0x1b   : > { %1065 = vsyncadd (%p957_p3), [#allocation3], 4294966272  ;;  %p253_p0 = scmp.lt.s32.totalorder %s1119_s19, 1  ;;  %v1073_v0 = vmov 1   ;;  %v1074_v1 = vmov 0   ;;  %v1075_v2 = vmov 0.0   ;;  %v288_v27 = vlaneseq }
  0x1c   : > { %981 = vset.pattern.permute.xlu1 %v1073_v0  ;;  %980 = vset.pattern.permute.xlu0 %v1074_v1  ;;  %vm1076_vm0 = vmmov 0   ;;  %v279_v5 = vld [vmem:[%s1322_s3 + $0x38] sm:$0xff]  ;;  %v278_v6 = vld [vmem:[%s1322_s3 + $0x30] sm:$0xff]  ;;  %v277_v7 = vld [vmem:[%s1322_s3 + $0x28] sm:$0xff]  ;;  %v1077_v8 = vmov 2   ;;  %v1078_v11 = vmov 3  }
  0x1d   : > { %s1327_s19 = smov (!%p253_p0, %s1119_s19), 1  ;;  %892 = vmatprep.subr.mxu1 %v1075_v2  ;;  %930 = vmatprep.subr.mxu0 %v1075_v2  ;;  %v276_v9 = vld [vmem:[%s1322_s3 + $0x20] sm:$0xff]  ;;  %v1176_v10 = vld [vmem:[#allocation2 + $0x38] sm:$0xff]  ;;  %v1079_v13 = vmov 4   ;;  %v274_v14 = vld [vmem:[%s1322_s3 + $0x10] sm:$0xff]  ;;  %v1080_v16 = vmov 6  }
  0x1e   : > { %s1147_s28 = sshll.u32 %s1327_s19, 3  ;;  %908 = vmatprep.mubr.msk.f32.mxu1 %vm1076_vm0, %v1075_v2  ;;  %946 = vmatprep.mubr.msk.f32.mxu0 %vm1076_vm0, %v1075_v2  ;;  %v275_v12 = vld [vmem:[%s1322_s3 + $0x18] sm:$0xff]  ;;  %v286_v15 = vld [vmem:[#allocation2 + $0x30] sm:$0xff]  ;;  %v273_v17 = vld [vmem:[%s1322_s3 + $0x8] sm:$0xff]  ;;  %v1081_v18 = vmov 5   ;;  %v1082_v21 = vmov 7  }
  0x1f   : > { %s260_s6 = scalar_lea.vmem %s1320_s1, %s1147_s28  ;;  %s256_s9 = scalar_lea.vmem %s1319_s0, %s1147_s28  ;;  %893 = vmatpush3.msra.mxu1 %v279_v5  ;;  %931 = vmatpush3.xpose.msra.mxu0 %v1176_v10  ;;  %v272_v19 = vld [vmem:[%s1322_s3] sm:$0xff]  ;;  %v285_v20 = vld [vmem:[#allocation2 + $0x28] sm:$0xff]  ;;  %v283_v23 = vld [vmem:[#allocation2 + $0x18] sm:$0xff]  ;;  %v1211_v28 = vand.u32 127, %v288_v27  ;;  %vm296_vm1 = vcmask 523264  }
  0x20   : > { %v270_v3 = vld [vmem:[%s260_s6] sm:$0xff]  ;;  %894 = vmatprep.subr.mxu1 %v1075_v2  ;;  %932 = vmatprep.subr.mxu0 %v1075_v2  ;;  %v282_v24 = vld [vmem:[#allocation2 + $0x10] sm:$0xff]  ;;  %v281_v25 = vld [vmem:[#allocation2 + $0x8] sm:$0xff]  ;;  %s264_s30 = scalar_lea.vmem %s1321_s2, %s1147_s28  ;;  %s268_s8 = scalar_lea.vmem %s1324_s5, %s1147_s28 }
  0x21   : > { %v269_v4 = vld [vmem:[%s256_s9] sm:$0xff]  ;;  %378 = vperm.xlu1 %981, %v270_v3   ;;  %895 = vmatpush3.msra.mxu1 %v278_v6 }
  0x22   : > { %291 = vperm.xlu0 %980, %v269_v4   ;;  %896 = vmatprep.subr.mxu1 %v1075_v2  ;;  %v284_v22 = vld [vmem:[#allocation2 + $0x20] sm:$0xff] }
  0x23   : > { %897 = vmatpush3.msra.mxu1 %v277_v7  ;;  %933 = vmatpush3.xpose.msra.mxu0 %v286_v15  ;;  %v280_v26 = vld [vmem:[#allocation2] sm:$0xff] }
  0x24   : > { %898 = vmatprep.subr.mxu1 %v1075_v2  ;;  %934 = vmatprep.subr.mxu0 %v1075_v2  ;;  %v271_v54 = vld [vmem:[%s264_s30] sm:$0xff] }
  0x25   : > { %982 = vset.pattern.permute.xlu1 %v1077_v8  ;;  %899 = vmatpush3.msra.mxu1 %v276_v9 }
  0x26   : > { %371 = vperm.xlu0 %980, %v270_v3   ;;  %385 = vperm.xlu1 %982, %v270_v3  }
  0x27   : > { %900 = vmatprep.subr.mxu1 %v1075_v2  ;;  %935 = vmatpush3.xpose.msra.mxu0 %v285_v20 }
  0x28   : > { %901 = vmatpush3.msra.mxu1 %v275_v12  ;;  %936 = vmatprep.subr.mxu0 %v1075_v2 }
  0x29   : > { %902 = vmatprep.subr.mxu1 %v1075_v2 }
  0x2a   : > { %983 = vset.pattern.permute.xlu0 %v1078_v11  ;;  %984 = vset.pattern.permute.xlu1 %v1079_v13 }
  0x2b   : > { %392 = vperm.xlu0 %983, %v270_v3   ;;  %399 = vperm.xlu1 %984, %v270_v3  }
  0x2c   : > { %903 = vmatpush3.msra.mxu1 %v274_v14  ;;  %937 = vmatpush3.xpose.msra.mxu0 %v284_v22 }
  0x2d   : > { %904 = vmatprep.subr.mxu1 %v1075_v2  ;;  %938 = vmatprep.subr.mxu0 %v1075_v2 }
  0x2e   : > { %905 = vmatpush3.msra.mxu1 %v273_v17 }
  0x2f   : > { %986 = vset.pattern.permute.xlu0 %v1080_v16  ;;  %985 = vset.pattern.permute.xlu1 %v1081_v18 }
  0x30   : > { %413 = vperm.xlu0 %986, %v270_v3   ;;  %406 = vperm.xlu1 %985, %v270_v3  }
  0x31   : > { %906 = vmatprep.subr.mxu1 %v1075_v2  ;;  %939 = vmatpush3.xpose.msra.mxu0 %v283_v23 }
  0x32   : > { %907 = vmatpush3.msra.mxu1 %v272_v19  ;;  %940 = vmatprep.subr.mxu0 %v1075_v2 }
  0x33   : > { %911 = vmatprep.subr.mxu1 %v1075_v2 }
  0x34   : > { %988 = vset.pattern.permute.xlu0 %v1074_v1  ;;  %987 = vset.pattern.permute.xlu1 %v1082_v21 }
  0x35   : > { %420 = vperm.xlu1 %987, %v270_v3   ;;  %941 = vmatpush3.xpose.msra.mxu0 %v282_v24 }
  0x36   : > { %942 = vmatprep.subr.mxu0 %v1075_v2  ;;  %582 = vperm.xlu0 %988, %v271_v54  }
  0x39   : > { %989 = vset.pattern.permute.xlu1 %v1073_v0  ;;  %943 = vmatpush3.xpose.msra.mxu0 %v281_v25 }
  0x3a   : > { %944 = vmatprep.subr.mxu0 %v1075_v2  ;;  %602 = vperm.xlu1 %989, %v271_v54  }
  0x3b   : > { %990 = vset.pattern.permute.xlu0 %v1077_v8 }
  0x3c   : > { %622 = vperm.xlu0 %990, %v271_v54  }
  0x3d   : > { %945 = vmatpush3.xpose.msra.mxu0 %v280_v26 }
  0x3e   : > { %991 = vset.pattern.permute.xlu1 %v1078_v11 }
  0x3f   : > { %642 = vperm.xlu1 %991, %v271_v54  }
  0x40   : > { %992 = vset.pattern.permute.xlu0 %v1079_v13 }
  0x41   : > { %662 = vperm.xlu0 %992, %v271_v54  }
  0x43   : > { %994 = vset.pattern.permute.xlu1 %v1080_v16 }
  0x44   : > { %702 = vperm.xlu1 %994, %v271_v54  }
  0x45   : > { %993 = vset.pattern.permute.xlu0 %v1081_v18 }
  0x46   : > { %682 = vperm.xlu0 %993, %v271_v54  }
  0x4a   : > { %995 = vset.pattern.permute.xlu0 %v1082_v21 }
  0x4b   : > { %722 = vperm.xlu0 %995, %v271_v54  }
  0x9c   : > { %v379_v30 = vpop.permute.xlu1 %378 }
  0x9d   : > { %v292_v29 = vpop.permute.xlu0 %291  ;;  %vm380_vm3 = vcmp.eq.s32.totalorder %v1211_v28, %v379_v30 }
  0x9e   : > { %vm293_vm2 = vcmp.eq.s32.totalorder %v1211_v28, %v292_v29  ;;  %v847_v32 = vsel %vm380_vm3, 1.0, %v1075_v2 }
  0x9f   : > { %v844_v31 = vsel %vm293_vm2, 1.0, %v1075_v2 }
  0xa0   : > { %909 = vmatmul.mubr.msk.f32.vlgmr.msra.gmra.mxu1 %vm296_vm1, %v844_v31 }
  0xa1   : > { %v372_v33 = vpop.permute.xlu0 %371  ;;  %912 = vmatpush3.msra.mxu1 %v1176_v10  ;;  %927 = vmatprep.mubr.msk.f32.mxu1 %vm1076_vm0, %v1075_v2  ;;  %v386_v34 = vpop.permute.xlu1 %385 }
  0xa2   : > { %vm373_vm4 = vcmp.eq.s32.totalorder %v1211_v28, %v372_v33  ;;  %913 = vmatprep.subr.mxu1 %v1075_v2  ;;  %vm387_vm5 = vcmp.eq.s32.totalorder %v1211_v28, %v386_v34 }
  0xa3   : > { %v846_v35 = vsel %vm373_vm4, 1.0, %v1075_v2  ;;  %914 = vmatpush3.msra.mxu1 %v286_v15  ;;  %v848_v37 = vsel %vm387_vm5, 1.0, %v1075_v2 }
  0xa4   : > { %v383_v36 = vadd.f32 %v847_v32, %v846_v35  ;;  %915 = vmatprep.subr.mxu1 %v1075_v2 }
  0xa5   : > { %916 = vmatpush3.msra.mxu1 %v285_v20 }
  0xa6   : > { %v390_v38 = vadd.f32 %v848_v37, %v383_v36  ;;  %v393_v39 = vpop.permute.xlu0 %392  ;;  %917 = vmatprep.subr.mxu1 %v1075_v2  ;;  %v400_v40 = vpop.permute.xlu1 %399 }
  0xa7   : > { %vm394_vm6 = vcmp.eq.s32.totalorder %v1211_v28, %v393_v39  ;;  %918 = vmatpush3.msra.mxu1 %v284_v22  ;;  %vm401_vm7 = vcmp.eq.s32.totalorder %v1211_v28, %v400_v40 }
  0xa8   : > { %v849_v41 = vsel %vm394_vm6, 1.0, %v1075_v2  ;;  %919 = vmatprep.subr.mxu1 %v1075_v2  ;;  %v850_v43 = vsel %vm401_vm7, 1.0, %v1075_v2 }
  0xa9   : > { %v397_v42 = vadd.f32 %v849_v41, %v390_v38  ;;  %920 = vmatpush3.msra.mxu1 %v283_v23 }
  0xaa   : > { %921 = vmatprep.subr.mxu1 %v1075_v2 }
  0xab   : > { %v414_v44 = vpop.permute.xlu0 %413  ;;  %922 = vmatpush3.msra.mxu1 %v282_v24  ;;  %v407_v45 = vpop.permute.xlu1 %406  ;;  %v404_v46 = vadd.f32 %v850_v43, %v397_v42 }
  0xac   : > { %vm415_vm8 = vcmp.eq.s32.totalorder %v1211_v28, %v414_v44  ;;  %923 = vmatprep.subr.mxu1 %v1075_v2  ;;  %vm408_vm9 = vcmp.eq.s32.totalorder %v1211_v28, %v407_v45 }
  0xad   : > { %924 = vmatpush3.msra.mxu1 %v281_v25  ;;  %v851_v47 = vsel %vm408_vm9, 1.0, %v1075_v2  ;;  %v852_v48 = vsel %vm415_vm8, 1.0, %v1075_v2 }
  0xae   : > { %925 = vmatprep.subr.mxu1 %v1075_v2  ;;  %v411_v49 = vadd.f32 %v851_v47, %v404_v46 }
  0xaf   : > { %926 = vmatpush3.msra.mxu1 %v280_v26 }
  0xb0   : > { %v418_v50 = vadd.f32 %v852_v48, %v411_v49  ;;  %v421_v51 = vpop.permute.xlu1 %420 }
  0xb1   : > { %vm422_vm10 = vcmp.eq.s32.totalorder %v1211_v28, %v421_v51  ;;  %v583_v6 = vpop.permute.xlu0 %582 }
  0xb2   : > { %v853_v52 = vsel %vm422_vm10, 1.0, %v1075_v2  ;;  %vm584_vm12 = vcmp.eq.s32.totalorder %v1211_v28, %v583_v6 }
  0xb3   : > { %v425_v53 = vadd.f32 %v853_v52, %v418_v50  ;;  %v855_v13 = vsel %vm584_vm12, 1.0, %v1075_v2 }
  0xb5   : > { %928 = vmatmul.mubr.msk.f32.vlgmr.msra.gmra.mxu1 %vm296_vm1, %v425_v53  ;;  %v603_v7 = vpop.permute.xlu1 %602 }
  0xb6   : > { %vm604_vm13 = vcmp.eq.s32.totalorder %v1211_v28, %v603_v7 }
  0xb7   : > { %v623_v8 = vpop.permute.xlu0 %622  ;;  %v856_v14 = vsel %vm604_vm13, 1.0, %v1075_v2 }
  0xb8   : > { %vm624_vm11 = vcmp.eq.s32.totalorder %v1211_v28, %v623_v8 }
  0xb9   : > { %v857_v11 = vsel %vm624_vm11, 1.0, %v1075_v2 }
  0xba   : > { %v643_v9 = vpop.permute.xlu1 %642 }
  0xbb   : > { %vm644_vm14 = vcmp.eq.s32.totalorder %v1211_v28, %v643_v9 }
  0xbc   : > { %v663_v10 = vpop.permute.xlu0 %662  ;;  %v858_v15 = vsel %vm644_vm14, 1.0, %v1075_v2 }
  0xbd   : > { %vm664_vm15 = vcmp.eq.s32.totalorder %v1211_v28, %v663_v10 }
  0xbe   : > { %v859_v25 = vsel %vm664_vm15, 1.0, %v1075_v2 }
  0xbf   : > { %v703_v12 = vpop.permute.xlu1 %702 }
  0xc0   : > { %vm704_vm0 = vcmp.eq.s32.totalorder %v1211_v28, %v703_v12 }
  0xc1   : > { %v683_v16 = vpop.permute.xlu0 %682  ;;  %v861_v26 = vsel %vm704_vm0, 1.0, %v1075_v2 }
  0xc2   : > { %vm684_vm2 = vcmp.eq.s32.totalorder %v1211_v28, %v683_v16 }
  0xc3   : > { %v860_v33 = vsel %vm684_vm2, 1.0, %v1075_v2 }
  0xc6   : > { %v723_v27 = vpop.permute.xlu0 %722 }
  0xc7   : > { %vm724_vm3 = vcmp.eq.s32.totalorder %v1211_v28, %v723_v27 }
  0xc8   : > { %v862_v37 = vsel %vm724_vm3, 1.0, %v1075_v2 }
 0x160   : > { %v366_v55 = vpop.f32.mrf.mxu1 }
 0x161   : > { %947 = vmatmul.mubr.f32.vlgmr.msra.gmra.mxu0 %v366_v55 }
 0x162   : > { %v910_v56 = vpop.f32.mrf.mxu1 }
 0x175   : > { %v495_v57 = vpop.f32.mrf.mxu1 }
 0x176   : > { %v499_v58 = vmul.f32 %v495_v57, %v366_v55 }
 0x177   : > { %v929_v59 = vpop.f32.mrf.mxu1 }
 0x178   : > { %v501_v60 = vand.u32 2147483647, %v499_v58  ;;  %v500_v3 = vmin.f32 %v499_v58, 0.0 }
 0x17a   : > { %v502_v61 = vsub.f32 0.0, %v501_v60 }
 0x17c   : > { %v503_v62 = vmul.f32 1.442695, %v502_v61 }
 0x17e   : > { %996 = vpow2.f32 %v503_v62 }
 0x18b   : > { %v997_v63 = vpop.eup %996 }
 0x18c   : > { %v505_v0 = vadd.f32 1.0, %v997_v63 }
 0x18e   : > { %998 = vlog2.f32 %v505_v0 }
 0x19b   : > { %v999_v1 = vpop.eup %998 }
 0x19c   : > { %v507_v4 = vmul.f32 0.6931472, %v999_v1 }
 0x19e   : > { %v508_v5 = vsub.f32 %v500_v3, %v507_v4 }
 0x1a0   : > { %509 = vadd.xlane.f32.xlu1 %v508_v5 }
 0x221   : > { %v577_v17 = vpop.f32.mrf.mxu0 }
 0x222   : > { %v587_v18 = vmul.f32 %v855_v13, %v577_v17  ;;  %v627_v19 = vmul.f32 %v857_v11, %v577_v17  ;;  %v607_v23 = vmul.f32 %v856_v14, %v577_v17  ;;  %v647_v24 = vmul.f32 %v858_v15, %v577_v17 }
 0x223   : > { %v948_v20 = vpop.f32.mrf.mxu0  ;;  %v707_v31 = vmul.f32 %v861_v26, %v577_v17  ;;  %v667_v32 = vmul.f32 %v859_v25, %v577_v17  ;;  %v687_v36 = vmul.f32 %v860_v33, %v577_v17  ;;  %v727_v39 = vmul.f32 %v862_v37, %v577_v17 }
 0x224   : > { %v588_v21 = vsel %vm296_vm1, %v587_v18, 0.0  ;;  %v628_v22 = vsel %vm296_vm1, %v627_v19, 0.0  ;;  %v608_v29 = vsel %vm296_vm1, %v607_v23, 0.0  ;;  %v648_v30 = vsel %vm296_vm1, %v647_v24, 0.0 }
 0x225   : > { %589 = vadd.xlane.f32.xlu0 %v588_v21  ;;  %629 = vadd.xlane.f32.xlu1 %v628_v22  ;;  %v708_v34 = vsel %vm296_vm1, %v707_v31, 0.0  ;;  %v668_v35 = vsel %vm296_vm1, %v667_v32, 0.0  ;;  %v688_v38 = vsel %vm296_vm1, %v687_v36, 0.0  ;;  %v728_v40 = vsel %vm296_vm1, %v727_v39, 0.0 }
 0x226   : > { %vm742_vm1 = vcmask 7168  }
 0x229   : > { %609 = vadd.xlane.f32.xlu0 %v608_v29  ;;  %649 = vadd.xlane.f32.xlu1 %v648_v30  ;;  %v1277_v41 = vpop.xlane.xlu1 %509 }
 0x22d   : > { %709 = vadd.xlane.f32.xlu1 %v708_v34  ;;  %669 = vadd.xlane.f32.xlu0 %v668_v35 }
 0x231   : > { %689 = vadd.xlane.f32.xlu0 %v688_v38 }
 0x235   : > { %729 = vadd.xlane.f32.xlu0 %v728_v40 }
 0x2ae   : > { %v1279_v42 = vpop.xlane.xlu1 %629  ;;  %v1281_v28 = vpop.xlane.xlu0 %589 }
 0x2af   : > { %v632_v43 = vand.u32 2147483647, %v1279_v42  ;;  %v592_v44 = vand.u32 2147483647, %v1281_v28  ;;  %v591_v32 = vmin.f32 %v1281_v28, 0.0  ;;  %v631_v36 = vmin.f32 %v1279_v42, 0.0 }
 0x2b1   : > { %v633_v2 = vsub.f32 0.0, %v632_v43  ;;  %v593_v45 = vsub.f32 0.0, %v592_v44 }
 0x2b2   : > { %v1285_v46 = vpop.xlane.xlu1 %649  ;;  %v1287_v47 = vpop.xlane.xlu0 %609 }
 0x2b3   : > { %v634_v48 = vmul.f32 1.442695, %v633_v2  ;;  %v594_v49 = vmul.f32 1.442695, %v593_v45  ;;  %v652_v50 = vand.u32 2147483647, %v1285_v46 }
 0x2b4   : > { %v612_v51 = vand.u32 2147483647, %v1287_v47  ;;  %v611_v33 = vmin.f32 %v1287_v47, 0.0  ;;  %v651_v43 = vmin.f32 %v1285_v46, 0.0 }
 0x2b5   : > { %1000 = vpow2.f32 %v634_v48  ;;  %v653_v52 = vsub.f32 0.0, %v652_v50 }
 0x2b6   : > { %1002 = vpow2.f32 %v594_v49  ;;  %v613_v53 = vsub.f32 0.0, %v612_v51  ;;  %v1291_v54 = vpop.xlane.xlu1 %709  ;;  %v1293_v55 = vpop.xlane.xlu0 %669 }
 0x2b7   : > { %v712_v56 = vand.u32 2147483647, %v1291_v54  ;;  %v672_v57 = vand.u32 2147483647, %v1293_v55  ;;  %v654_v58 = vmul.f32 1.442695, %v653_v52 }
 0x2b8   : > { %v614_v59 = vmul.f32 1.442695, %v613_v53  ;;  %v671_v28 = vmin.f32 %v1293_v55, 0.0 }
 0x2b9   : > { %v713_v60 = vsub.f32 0.0, %v712_v56  ;;  %v673_v61 = vsub.f32 0.0, %v672_v57  ;;  %1004 = vpow2.f32 %v654_v58  ;;  %v711_v57 = vmin.f32 %v1291_v54, 0.0 }
 0x2ba   : > { %v1297_v62 = vpop.xlane.xlu0 %689  ;;  %1006 = vpow2.f32 %v614_v59 }
 0x2bb   : > { %v714_v63 = vmul.f32 1.442695, %v713_v60  ;;  %v674_v0 = vmul.f32 1.442695, %v673_v61  ;;  %v692_v1 = vand.u32 2147483647, %v1297_v62 }
 0x2bc   : > { %v691_v47 = vmin.f32 %v1297_v62, 0.0 }
 0x2bd   : > { %1008 = vpow2.f32 %v714_v63  ;;  %v693_v3 = vsub.f32 0.0, %v692_v1 }
 0x2be   : > { %1010 = vpow2.f32 %v674_v0  ;;  %v1300_v4 = vpop.xlane.xlu0 %729 }
 0x2bf   : > { %v732_v5 = vand.u32 2147483647, %v1300_v4  ;;  %v694_v6 = vmul.f32 1.442695, %v693_v3  ;;  %v731_v61 = vmin.f32 %v1300_v4, 0.0 }
 0x2c1   : > { %v733_v7 = vsub.f32 0.0, %v732_v5  ;;  %1012 = vpow2.f32 %v694_v6 }
 0x2c2   : > { %v1001_v8 = vpop.eup %1000 }
 0x2c3   : > { %v1003_v9 = vpop.eup %1002  ;;  %v734_v10 = vmul.f32 1.442695, %v733_v7  ;;  %v636_v12 = vadd.f32 1.0, %v1001_v8 }
 0x2c4   : > { %v596_v11 = vadd.f32 1.0, %v1003_v9 }
 0x2c6   : > { %1014 = vlog2.f32 %v596_v11  ;;  %v1005_v13 = vpop.eup %1004 }
 0x2c7   : > { %1016 = vpow2.f32 %v734_v10  ;;  %v1007_v14 = vpop.eup %1006  ;;  %v656_v15 = vadd.f32 1.0, %v1005_v13 }
 0x2c8   : > { %1018 = vlog2.f32 %v636_v12  ;;  %v616_v16 = vadd.f32 1.0, %v1007_v14 }
 0x2c9   : > { %1020 = vlog2.f32 %v656_v15 }
 0x2ca   : > { %v1009_v17 = vpop.eup %1008  ;;  %1022 = vlog2.f32 %v616_v16 }
 0x2cb   : > { %v1011_v18 = vpop.eup %1010  ;;  %v716_v20 = vadd.f32 1.0, %v1009_v17 }
 0x2cc   : > { %v676_v19 = vadd.f32 1.0, %v1011_v18 }
 0x2ce   : > { %1024 = vlog2.f32 %v676_v19  ;;  %v1013_v21 = vpop.eup %1012 }
 0x2cf   : > { %v696_v22 = vadd.f32 1.0, %v1013_v21  ;;  %1026 = vlog2.f32 %v716_v20 }
 0x2d1   : > { %1028 = vlog2.f32 %v696_v22 }
 0x2d3   : > { %v1015_v23 = vpop.eup %1014 }
 0x2d4   : > { %v1017_v24 = vpop.eup %1016  ;;  %v598_v29 = vmul.f32 0.6931472, %v1015_v23 }
 0x2d5   : > { %v736_v25 = vadd.f32 1.0, %v1017_v24  ;;  %v1019_v26 = vpop.eup %1018 }
 0x2d6   : > { %v1021_v27 = vpop.eup %1020  ;;  %v638_v31 = vmul.f32 0.6931472, %v1019_v26  ;;  %v599_v37 = vsub.f32 %v591_v32, %v598_v29 }
 0x2d7   : > { %1030 = vlog2.f32 %v736_v25  ;;  %v1023_v30 = vpop.eup %1022  ;;  %v658_v38 = vmul.f32 0.6931472, %v1021_v27 }
 0x2d8   : > { %v618_v34 = vmul.f32 0.6931472, %v1023_v30  ;;  %v639_v40 = vsub.f32 %v631_v36, %v638_v31 }
 0x2d9   : > { %v659_v49 = vsub.f32 %v651_v43, %v658_v38 }
 0x2da   : > { %v619_v39 = vsub.f32 %v611_v33, %v618_v34 }
 0x2db   : > { %v1025_v35 = vpop.eup %1024 }
 0x2dc   : > { %v620_v44 = vadd.f32 %v619_v39, %v599_v37  ;;  %v678_v2 = vmul.f32 0.6931472, %v1025_v35  ;;  %v1027_v45 = vpop.eup %1026 }
 0x2dd   : > { %v718_v52 = vmul.f32 0.6931472, %v1027_v45 }
 0x2de   : > { %v1029_v48 = vpop.eup %1028  ;;  %v640_v50 = vadd.f32 %v639_v40, %v620_v44  ;;  %v679_v53 = vsub.f32 %v671_v28, %v678_v2 }
 0x2df   : > { %v698_v51 = vmul.f32 0.6931472, %v1029_v48  ;;  %v719_v59 = vsub.f32 %v711_v57, %v718_v52 }
 0x2e0   : > { %v660_v42 = vadd.f32 %v659_v49, %v640_v50 }
 0x2e1   : > { %v699_v56 = vsub.f32 %v691_v47, %v698_v51 }
 0x2e2   : > { %v680_v58 = vadd.f32 %v679_v53, %v660_v42 }
 0x2e4   : > { %v1031_v46 = vpop.eup %1030  ;;  %v700_v60 = vadd.f32 %v699_v56, %v680_v58 }
 0x2e5   : > { %v738_v63 = vmul.f32 0.6931472, %v1031_v46 }
 0x2e6   : > { %v720_v0 = vadd.f32 %v719_v59, %v700_v60 }
 0x2e7   : > { %v739_v1 = vsub.f32 %v731_v61, %v738_v63 }
 0x2e9   : > { %v740_v55 = vadd.f32 %v739_v1, %v720_v0 }
 0x2eb   : > { %v741_v62 = vadd.f32 %v740_v55, %v1277_v41 }
 0x2ed   : > { %743 = vst.msk [vmem:[%s268_s8] sm:$0xff] %vm742_vm1, %v741_v62 }
 0x2ee PF: > { %s16_s18 = sadd.s32 1, %s1068_s18  }
 0x2ef   : > { %p13_p1 = scmp.ge.s32.totalorder %s16_s18, 4  }
 0x2f1   :  { %15 = sbr.rel (!%p13_p1) target bundleno = 1 (0x1), region = 81 }
 0x2f6   :  { %763 = vsyncpa [#allocation3], 1 }
 0x2f7   :  { %765 = vsyncpa [#allocation3 + $0x1], 1 }

</bundles_post_ra>
